<compile_context>
chip_gen: v7x
topology: tpu7x:2x2x1
jax: 0.10.0
libtpu: 0.0.40
codegen_flags: <defaults>
</compile_context>

<pallas_src>
import functools

import jax
import jax.numpy as jnp
from jax.experimental import pallas as pl
from jax.experimental.pallas import tpu as pltpu

BN_EPS = 1e-5
_VMEM_LIMIT = 32 * 1024 * 1024        # safe on v5e/v6e (128 MiB) and v7x (64 MiB)
_TILE_VMEM_BUDGET = 24 * 1024 * 1024  # tile-dependent VMEM; leaves headroom under limit
_MAX_TP = 4096                        # packed rows / tile (≈2-8 MiB blocks: near roofline)
_FUSED_MAX_ROWS = 2048                # below this, run the single fused VMEM kernel
_NCORES = 2                           # stats-pass core split; serial (harmless) on 1-TC chips


def _round_up(x, m):
    return (x + m - 1) // m * m


def _cdiv(a, b):
    return (a + b - 1) // b


# --------------------------------------------------------------------------
# Kernels
# --------------------------------------------------------------------------
def _fused_kernel(x_ref, gamma_ref, beta_ref, w_ref, b_ref, o_ref, *, n_rows):
    """Small-N path: whole problem VMEM-resident, single grid step."""
    xf = x_ref[...].astype(jnp.float32)
    inv_n = jnp.float32(1.0 / n_rows)
    s = jnp.sum(xf, axis=0, keepdims=True)
    ss = jnp.sum(xf * xf, axis=0, keepdims=True)
    mean = s * inv_n
    var = jnp.maximum(ss * inv_n - mean * mean, 0.0)     # biased batch variance
    inv_std = jax.lax.rsqrt(var + BN_EPS)
    scale = gamma_ref[...] * inv_std
    shift = beta_ref[...] - mean * scale
    xn = xf * scale + shift
    y = jnp.dot(xn, w_ref[...], preferred_element_type=jnp.float32) + b_ref[...]
    # sigmoid(y) = 0.5 * tanh(0.5*y) + 0.5  -> single EUP transcendental/elem.
    o_ref[...] = (0.5 * jnp.tanh(0.5 * y) + 0.5).astype(o_ref.dtype)


def _stats_kernel(x_ref, stats_ref, *, tp, tiles_per_core, valid_rows):
    """Accumulate per-lane sum (row 0) and sum-of-squares (row 1) in f32.

    Grid is (core, tile); each core owns its own (8, dp) accumulator block.
    Rows with global packed-row index >= valid_rows (ragged last tile's stale
    VMEM, or phantom grid cells clamped onto the last tile) are masked to 0,
    so no input padding is required and clamped re-reads never double count.
    """
    c = pl.program_id(0)
    t = pl.program_id(1)

    @pl.when(t == 0)
    def _():
        stats_ref[...] = jnp.zeros_like(stats_ref)

    start = (c * tiles_per_core + t) * tp                 # UNclamped global row index
    row_id = start + jax.lax.broadcasted_iota(jnp.int32, x_ref.shape, 0)
    xf = jnp.where(row_id < valid_rows, x_ref[...].astype(jnp.float32), 0.0)
    stats_ref[0:1, :] += jnp.sum(xf, axis=0, keepdims=True)
    stats_ref[1:2, :] += jnp.sum(xf * xf, axis=0, keepdims=True)


def _apply_kernel(x_ref, w_ref, b_ref, o_ref):
    """y = sigmoid(x @ W_fold + b_fold); BN affine already folded into W/b."""
    y = jnp.dot(x_ref[...], w_ref[...], preferred_element_type=jnp.float32)
    y = y + b_ref[...]
    o_ref[...] = (0.5 * jnp.tanh(0.5 * y) + 0.5).astype(o_ref.dtype)


# --------------------------------------------------------------------------
# Wrapper
# --------------------------------------------------------------------------
@jax.jit
def embedder_forward(object_vectors, gamma, beta, w_t, bias):
    """BatchNorm1d(batch stats) -> Linear -> Sigmoid on (..., D) -> (..., E)."""
    lead = object_vectors.shape[:-1]
    d = object_vectors.shape[-1]
    e = w_t.shape[-1]
    x = object_vectors.reshape(-1, d)
    n = x.shape[0]
    in_dtype = x.dtype
    itemsize = jnp.dtype(in_dtype).itemsize

    gamma = gamma.reshape(1, d).astype(jnp.float32)
    beta = beta.reshape(1, d).astype(jnp.float32)
    w_f32 = w_t.astype(jnp.float32)
    bias = bias.reshape(1, e).astype(jnp.float32)

    # ---------------- small-N fast path: single fused kernel ----------------
    fused_vmem = 8 * n * (_round_up(d, 128) + _round_up(e, 128))  # ~2 f32 bufs each
    if n <= _FUSED_MAX_ROWS and fused_vmem <= 16 * 1024 * 1024:
        out = pl.pallas_call(
            functools.partial(_fused_kernel, n_rows=n),
            out_shape=jax.ShapeDtypeStruct((n, e), in_dtype),
            grid=(1,),
            in_specs=[
                pl.BlockSpec((n, d), lambda i: (0, 0)),
                pl.BlockSpec((1, d), lambda i: (0, 0)),
                pl.BlockSpec((1, d), lambda i: (0, 0)),
                pl.BlockSpec((d, e), lambda i: (0, 0)),
                pl.BlockSpec((1, e), lambda i: (0, 0)),
            ],
            out_specs=pl.BlockSpec((n, e), lambda i: (0, 0)),
            compiler_params=pltpu.CompilerParams(
                dimension_semantics=("arbitrary",),
                vmem_limit_bytes=_VMEM_LIMIT,
            ),
        )(x, gamma, beta, w_f32, bias)
        return out.reshape(*lead, e)

    # ---------------- streaming path: stats pass + folded matmul -------------
    # Lane packing: `pack` logical rows per physical row so loads are
    # lane-dense and the output last dim is >= 128 (unmasked stores).
    # NOTE: pack == 1 with d or e below 128 reintroduces masked partial
    # loads/stores (perf cliff, not a correctness issue).
    pack = 128 // d if (d < 128 and 128 % d == 0) else 1
    dp, ep = d * pack, e * pack

    n_pp = _round_up(n, pack)
    if n_pp != n:
        # Rare corner (n % pack != 0): zero-pad < pack rows.  XLA materializes
        # this as a copy of x; the common pack-aligned case is copy-free.
        x = jnp.pad(x, ((0, n_pp - n), (0, 0)))
    packed_rows = n_pp // pack
    x_packed = x.reshape(packed_rows, dp)          # row-major contiguous -> free

    # Tile size: biggest block within the VMEM budget (triple-buffered x +
    # double-buffered out), capped so the grid keeps >= _NCORES tiles for
    # megacore sharding on v7x.
    per_row_bytes = (3 * dp + 2 * ep) * itemsize
    tp = _TILE_VMEM_BUDGET // per_row_bytes
    tp = min(tp, _MAX_TP, _cdiv(packed_rows, _NCORES))
    tp = max(8, tp // 8 * 8)
    num_tiles = _cdiv(packed_rows, tp)             # >= _NCORES by construction
    tiles_per_core = _cdiv(num_tiles, _NCORES)
    last_tile = num_tiles - 1

    # ---- pass 1: per-feature sum / sum-of-squares, split across 2 cores ----
    def stats_x_map(c, t):
        # Clamp phantom grid cells (num_tiles % _NCORES != 0) onto the last
        # real tile; the kernel masks them out by (unclamped) global row index.
        return (jnp.minimum(c * tiles_per_core + t, last_tile), 0)

    stats_raw = pl.pallas_call(
        functools.partial(_stats_kernel, tp=tp, tiles_per_core=tiles_per_core,
                          valid_rows=packed_rows),
        out_shape=jax.ShapeDtypeStruct((_NCORES * 8, dp), jnp.float32),
        grid=(_NCORES, tiles_per_core),
        in_specs=[pl.BlockSpec((tp, dp), stats_x_map,
                               pipeline_mode=pl.Buffered(3))],
        out_specs=pl.BlockSpec((8, dp), lambda c, t: (c, 0)),
        compiler_params=pltpu.CompilerParams(
            dimension_semantics=("parallel", "arbitrary"),
            vmem_limit_bytes=_VMEM_LIMIT,
        ),
        cost_estimate=pl.CostEstimate(
            flops=3 * n_pp * d,
            transcendentals=0,
            bytes_accessed=n_pp * d * itemsize + _NCORES * 8 * dp * 4,
        ),
    )(x_packed)

    # Finish BN stats (tiny f32 XLA ops) and fold BN into the Linear layer.
    stats = stats_raw.reshape(_NCORES, 8, dp)[:, 0:2, :].sum(axis=0)   # (2, dp)
    stats = stats.reshape(2, pack, d).sum(axis=1)                      # (2, d)
    n_f = jnp.float32(n)
    mean = stats[0:1] / n_f
    # TODO(synk): E[x^2]-E[x]^2 can cancel badly if |mean| >> std; switch to
    # shifted sums if inputs are far from centered.
    var = jnp.maximum(stats[1:2] / n_f - mean * mean, 0.0)             # biased var
    inv_std = jax.lax.rsqrt(var + BN_EPS)

    #   ((x - mean) * inv_std * gamma + beta) @ W + b  ==  x @ W' + b'
    scale = gamma * inv_std                                            # (1, d)
    shift = beta - mean * scale                                        # (1, d)
    w_fold = scale.reshape(d, 1) * w_f32                               # (d, e)
    b_fold = bias + shift @ w_f32                                      # (1, e)

    # Block-diagonal weight keeps the row-packed layout valid:
    #   y_packed[:, g*e:(g+1)*e] = x_packed[:, g*d:(g+1)*d] @ W'
    w_bd = jnp.kron(jnp.eye(pack, dtype=jnp.float32), w_fold)          # (dp, ep)
    b_bd = jnp.tile(b_fold, (1, pack))                                 # (1, ep) f32
    if in_dtype == jnp.bfloat16:
        w_bd = w_bd.astype(jnp.bfloat16)     # bf16 MXU operands, f32 accumulate

    # ---- pass 2: y = sigmoid(x @ W' + b'), independent ("parallel") tiles ----
    out_packed = pl.pallas_call(
        _apply_kernel,
        out_shape=jax.ShapeDtypeStruct((packed_rows, ep), in_dtype),
        grid=(num_tiles,),
        in_specs=[
            pl.BlockSpec((tp, dp), lambda i: (i, 0), pipeline_mode=pl.Buffered(3)),
            pl.BlockSpec((dp, ep), lambda i: (0, 0)),
            pl.BlockSpec((1, ep), lambda i: (0, 0)),
        ],
        out_specs=pl.BlockSpec((tp, ep), lambda i: (i, 0)),
        compiler_params=pltpu.CompilerParams(
            dimension_semantics=("parallel",),      # shards across v7x's 2 TCs
            vmem_limit_bytes=_VMEM_LIMIT,
        ),
        cost_estimate=pl.CostEstimate(
            flops=2 * n_pp * dp * e,
            transcendentals=n_pp * e,
            bytes_accessed=(n_pp * d + n_pp * e) * itemsize + (dp * ep + ep) * 4,
        ),
    )(x_packed, w_bd, b_bd)

    out = out_packed.reshape(n_pp, e)
    if n_pp != n:
        out = out[:n]
    return out.reshape(*lead, e)


# --------------------------------------------------------------------------
# Reference + tests
# --------------------------------------------------------------------------
def _reference(object_vectors, gamma, beta, w_t, bias):
    shape = object_vectors.shape
    x = object_vectors.reshape(-1, shape[-1]).astype(jnp.float32)
    mean = jnp.mean(x, axis=0, keepdims=True)
    var = jnp.mean((x - mean) ** 2, axis=0, keepdims=True)
    x_norm = (x - mean) / jnp.sqrt(var + BN_EPS)
    x_scaled = x_norm * gamma.reshape(1, -1) + beta.reshape(1, -1)
    y = x_scaled @ w_t.astype(jnp.float32) + bias.reshape(1, -1)
    out = jax.nn.sigmoid(y)
    return out.reshape(*shape[:-1], w_t.shape[-1])


if __name__ == "__main__":
    d_in = 32    # object_vector_dim
    d_emb = 64   # embedding_dim

    key = jax.random.PRNGKey(0)
    k_x, k_w, k_b, k_g, k_bt, k_x2, k_x3 = jax.random.split(key, 7)

    gamma = jax.random.uniform(k_g, (d_in,), jnp.float32, 0.5, 1.5)
    beta = jax.random.uniform(k_bt, (d_in,), jnp.float32, -0.5, 0.5)
    bound = 1.0 / (d_in ** 0.5)
    w_t = jax.random.uniform(k_w, (d_in, d_emb), jnp.float32, -bound, bound)
    bias = jax.random.uniform(k_b, (d_emb,), jnp.float32, -bound, bound)

    # 1) small-batch fused path (N = 16 rows, VMEM-resident single kernel).
    x_small = jax.random.normal(k_x, (2, 8, d_in), dtype=jnp.float32)
    out = jax.block_until_ready(embedder_forward(x_small, gamma, beta, w_t, bias))
    ref = _reference(x_small, gamma, beta, w_t, bias)
    assert out.shape == (2, 8, d_emb), out.shape
    assert jnp.allclose(out, ref, atol=1e-4, rtol=1e-4), "f32 fused-path mismatch"

    # 2) streaming path: multi-tile, ragged last tile, n % pack == 0 (N = 2500).
    x_big = jax.random.normal(k_x2, (5, 500, d_in), dtype=jnp.float32) * 1.5 + 0.3
    out_big = jax.block_until_ready(embedder_forward(x_big, gamma, beta, w_t, bias))
    ref_big = _reference(x_big, gamma, beta, w_t, bias)
    assert out_big.shape == (5, 500, d_emb), out_big.shape
    assert jnp.allclose(out_big, ref_big, atol=1e-4, rtol=1e-4), "f32 streaming mismatch"

    # 3) streaming path with n % pack != 0 (N = 2501, tiny pad corner).
    x_odd = jax.random.normal(k_x3, (2501, d_in), dtype=jnp.float32)
    out_odd = jax.block_until_ready(embedder_forward(x_odd, gamma, beta, w_t, bias))
    ref_odd = _reference(x_odd, gamma, beta, w_t, bias)
    assert out_odd.shape == (2501, d_emb), out_odd.shape
    assert jnp.allclose(out_odd, ref_odd, atol=1e-4, rtol=1e-4), "f32 ragged-pack mismatch"

    # 4) bf16 inputs on both paths (bf16 MXU operands, f32 stats/accumulate).
    out_bf_s = jax.block_until_ready(
        embedder_forward(x_small.astype(jnp.bfloat16), gamma, beta, w_t, bias))
    assert out_bf_s.dtype == jnp.bfloat16
    assert jnp.allclose(out_bf_s.astype(jnp.float32), ref, atol=3e-2, rtol=3e-2), \
        "bf16 fused mismatch"
    out_bf_b = jax.block_until_ready(
        embedder_forward(x_big.astype(jnp.bfloat16), gamma, beta, w_t, bias))
    assert out_bf_b.dtype == jnp.bfloat16
    assert jnp.allclose(out_bf_b.astype(jnp.float32), ref_big, atol=3e-2, rtol=3e-2), \
        "bf16 streaming mismatch"

    print("KERNEL_OK")
</pallas_src>

<mosaic_0001>
module attributes {stable_mosaic.version = 11 : i64} {
  func.func @_fused_kernel(%arg0: i32, %arg1: memref<16x32xf32, #tpu.memory_space<vmem>>, %arg2: memref<1x32xf32, #tpu.memory_space<vmem>>, %arg3: memref<1x32xf32, #tpu.memory_space<vmem>>, %arg4: memref<32x64xf32, #tpu.memory_space<vmem>>, %arg5: memref<1x64xf32, #tpu.memory_space<vmem>>, %arg6: memref<16x64xf32, #tpu.memory_space<vmem>>) attributes {dimension_semantics = [#tpu.dimension_semantics<arbitrary>], iteration_bounds = array<i64: 1>, scalar_prefetch = 0 : i64, scratch_operands = 0 : i64, tpu.core_type = #tpu.core_type<tc>, window_params = [{pipeline_mode = #tpu.pipeline_mode<synchronous>, transform_indices = @transform_0, window_bounds = array<i64: 16, 32>}, {pipeline_mode = #tpu.pipeline_mode<synchronous>, transform_indices = @transform_1, window_bounds = array<i64: 1, 32>}, {pipeline_mode = #tpu.pipeline_mode<synchronous>, transform_indices = @transform_2, window_bounds = array<i64: 1, 32>}, {pipeline_mode = #tpu.pipeline_mode<synchronous>, transform_indices = @transform_3, window_bounds = array<i64: 32, 64>}, {pipeline_mode = #tpu.pipeline_mode<synchronous>, transform_indices = @transform_4, window_bounds = array<i64: 1, 64>}, {pipeline_mode = #tpu.pipeline_mode<synchronous>, transform_indices = @transform_5, window_bounds = array<i64: 16, 64>}]} {
    %c0 = arith.constant 0 : index
    %c0_0 = arith.constant 0 : index
    %0 = vector.load %arg1[%c0, %c0_0] : memref<16x32xf32, #tpu.memory_space<vmem>>, vector<16x32xf32>
    %cst = arith.constant dense<0.000000e+00> : vector<32xf32>
    %1 = vector.multi_reduction <add>, %0, %cst [0] : vector<16x32xf32> to vector<32xf32>
    %2 = vector.shape_cast %1 : vector<32xf32> to vector<1x32xf32>
    %3 = arith.mulf %0, %0 : vector<16x32xf32>
    %cst_1 = arith.constant dense<0.000000e+00> : vector<32xf32>
    %4 = vector.multi_reduction <add>, %3, %cst_1 [0] : vector<16x32xf32> to vector<32xf32>
    %5 = vector.shape_cast %4 : vector<32xf32> to vector<1x32xf32>
    %cst_2 = arith.constant 6.250000e-02 : f32
    %6 = vector.broadcast %cst_2 : f32 to vector<1x32xf32>
    %7 = arith.mulf %2, %6 : vector<1x32xf32>
    %cst_3 = arith.constant 6.250000e-02 : f32
    %8 = vector.broadcast %cst_3 : f32 to vector<1x32xf32>
    %9 = arith.mulf %5, %8 : vector<1x32xf32>
    %10 = arith.mulf %7, %7 : vector<1x32xf32>
    %11 = arith.subf %9, %10 : vector<1x32xf32>
    %cst_4 = arith.constant 0.000000e+00 : f32
    %12 = vector.broadcast %cst_4 : f32 to vector<1x32xf32>
    %13 = arith.maximumf %11, %12 : vector<1x32xf32>
    %cst_5 = arith.constant 9.99999974E-6 : f32
    %14 = vector.broadcast %cst_5 : f32 to vector<1x32xf32>
    %15 = arith.addf %13, %14 : vector<1x32xf32>
    %16 = math.rsqrt %15 : vector<1x32xf32>
    %c0_6 = arith.constant 0 : index
    %c0_7 = arith.constant 0 : index
    %17 = vector.load %arg2[%c0_6, %c0_7] : memref<1x32xf32, #tpu.memory_space<vmem>>, vector<1x32xf32>
    %18 = arith.mulf %17, %16 : vector<1x32xf32>
    %c0_8 = arith.constant 0 : index
    %c0_9 = arith.constant 0 : index
    %19 = vector.load %arg3[%c0_8, %c0_9] : memref<1x32xf32, #tpu.memory_space<vmem>>, vector<1x32xf32>
    %20 = arith.mulf %7, %18 : vector<1x32xf32>
    %21 = arith.subf %19, %20 : vector<1x32xf32>
    %22 = vector.broadcast %18 : vector<1x32xf32> to vector<16x32xf32>
    %23 = arith.mulf %0, %22 : vector<16x32xf32>
    %24 = vector.broadcast %21 : vector<1x32xf32> to vector<16x32xf32>
    %25 = arith.addf %23, %24 : vector<16x32xf32>
    %c0_10 = arith.constant 0 : index
    %c0_11 = arith.constant 0 : index
    %26 = vector.load %arg4[%c0_10, %c0_11] : memref<32x64xf32, #tpu.memory_space<vmem>>, vector<32x64xf32>
    %cst_12 = arith.constant dense<0.000000e+00> : vector<16x64xf32>
    %27 = tpu.matmul %25, %26, %cst_12 {dimension_numbers = #tpu.dot_dimension_numbers<[1], [0], [0], [1], [0, 0, 1, 1], [], []>} : vector<16x32xf32>, vector<32x64xf32>, vector<16x64xf32> -> vector<16x64xf32>
    %c0_13 = arith.constant 0 : index
    %c0_14 = arith.constant 0 : index
    %28 = vector.load %arg5[%c0_13, %c0_14] : memref<1x64xf32, #tpu.memory_space<vmem>>, vector<1x64xf32>
    %29 = vector.broadcast %28 : vector<1x64xf32> to vector<16x64xf32>
    %30 = arith.addf %27, %29 : vector<16x64xf32>
    %cst_15 = arith.constant 5.000000e-01 : f32
    %31 = vector.broadcast %cst_15 : f32 to vector<16x64xf32>
    %32 = arith.mulf %31, %30 : vector<16x64xf32>
    %33 = math.tanh %32 : vector<16x64xf32>
    %cst_16 = arith.constant 5.000000e-01 : f32
    %34 = vector.broadcast %cst_16 : f32 to vector<16x64xf32>
    %35 = arith.mulf %34, %33 : vector<16x64xf32>
    %cst_17 = arith.constant 5.000000e-01 : f32
    %36 = vector.broadcast %cst_17 : f32 to vector<16x64xf32>
    %37 = arith.addf %35, %36 : vector<16x64xf32>
    %c0_18 = arith.constant 0 : index
    %c0_19 = arith.constant 0 : index
    %38 = vector.load %arg6[%c0_18, %c0_19] : memref<16x64xf32, #tpu.memory_space<vmem>>, vector<16x64xf32>
    tpu.vector_store %arg6[%c0_18, %c0_19], %37 {strides = array<i32>} : memref<16x64xf32, #tpu.memory_space<vmem>>, vector<16x64xf32>,
    return
  }
  func.func @transform_0(%arg0: i32) -> (i32, i32) {
    %c0_i32 = arith.constant 0 : i32
    %c0_i32_0 = arith.constant 0 : i32
    %c0_i32_1 = arith.constant 0 : i32
    return %c0_i32, %c0_i32_0 : i32, i32
  }
  func.func @transform_1(%arg0: i32) -> (i32, i32) {
    %c0_i32 = arith.constant 0 : i32
    %c0_i32_0 = arith.constant 0 : i32
    %c0_i32_1 = arith.constant 0 : i32
    return %c0_i32, %c0_i32_0 : i32, i32
  }
  func.func @transform_2(%arg0: i32) -> (i32, i32) {
    %c0_i32 = arith.constant 0 : i32
    %c0_i32_0 = arith.constant 0 : i32
    %c0_i32_1 = arith.constant 0 : i32
    return %c0_i32, %c0_i32_0 : i32, i32
  }
  func.func @transform_3(%arg0: i32) -> (i32, i32) {
    %c0_i32 = arith.constant 0 : i32
    %c0_i32_0 = arith.constant 0 : i32
    %c0_i32_1 = arith.constant 0 : i32
    return %c0_i32, %c0_i32_0 : i32, i32
  }
  func.func @transform_4(%arg0: i32) -> (i32, i32) {
    %c0_i32 = arith.constant 0 : i32
    %c0_i32_0 = arith.constant 0 : i32
    %c0_i32_1 = arith.constant 0 : i32
    return %c0_i32, %c0_i32_0 : i32, i32
  }
  func.func @transform_5(%arg0: i32) -> (i32, i32) {
    %c0_i32 = arith.constant 0 : i32
    %c0_i32_0 = arith.constant 0 : i32
    %c0_i32_1 = arith.constant 0 : i32
    return %c0_i32, %c0_i32_0 : i32, i32
  }
}

</mosaic_0001>

<bundles_post_ra>
// kernel: embedder_forward.1
= control target key start
LH: loop header
LB: loop body
LE: loop exit
PB: predicated region body
PF: predicated region fallthrough
CT: control target
= control target key end

     0   :  { %10 = vsyncpa [#allocation3], 0  ;;  %s427_s0 = inlined_call_operand.hbm [shape: f32[16,32], index: 0, kind: input, shape index: {}]   ;;  %s428_s1 = inlined_call_operand.vmem [shape: f32[1,32], index: 1, kind: input, shape index: {}]   ;;  %s429_s2 = inlined_call_operand.vmem [shape: f32[1,32], index: 2, kind: input, shape index: {}]   ;;  %s430_s3 = inlined_call_operand.hbm [shape: f32[32,64], index: 3, kind: input, shape index: {}]   ;;  %s431_s4 = inlined_call_operand.vmem [shape: f32[1,64], index: 4, kind: input, shape index: {}]   ;;  %s432_s5 = inlined_call_operand.hbm [shape: f32[16,64], index: 5, kind: output, shape index: {}]  }
   0x1   :  { %11 = vsyncpa [#allocation6], 0 }
   0x2   :  { %12 = vsyncpa [#allocation4], 0  ;;  %s332_s18 = smov [#allocation2]   ;;  %s260_s22 = scalar_lea.hbm %s427_s0, 256 }
   0x3   :  { %s18_s19 = sshll.u32 %s332_s18, 4  ;;  %p261_p0 = scmp.ne.s32.totalorder %s427_s0, %s260_s22  ;;  %s19_s19 = int_to_ptr.vmem [resolvable:$true] %s18_s19 }
   0x4   :  { %p264_p1 = scmp.lt.u32.totalorder %s260_s22, %s427_s0 }
   0x6   :  { %p266_p2 = pnand %p264_p1, %p261_p0 }
   0x8   :  { %269 = shalt.err (!%p266_p2)
}
   0x9   :  { %s270_s27 = scalar_lea.vmem %s19_s19, 256  ;;  %p275_p4 = scmp.lt.s32.totalorder %s19_s19, %s19_s19 }
   0xa   :  { %p271_p3 = scmp.ne.s32.totalorder %s19_s19, %s270_s27  ;;  %p276_p5 = scmp.lt.s32.totalorder %s270_s27, %s270_s27 }
   0xc   :  { %p277_p6 = por %p276_p5, %p275_p4 }
   0xe   :  { %p278_p7 = pnand %p277_p6, %p271_p3 }
  0x10   :  { %281 = shalt.err (!%p278_p7)
}
  0x11   :  { %s333_s28 = smov 128   ;;  %s334_s29 = smov 8  }
  0x12   :  { %24 = dma.hbm_to_vmem [thread:$0]  %s427_s0, 256, %s19_s19, [#allocation3], %s333_s28, %s333_s28, %s334_s29  }
  0x13   :  { %s335_s7 = smov [#allocation5]   ;;  %s282_s11 = scalar_lea.hbm %s430_s3, 512 }
  0x14   :  { %s34_s8 = sshll.u32 %s335_s7, 4  ;;  %p283_p8 = scmp.ne.s32.totalorder %s430_s3, %s282_s11  ;;  %s35_s8 = int_to_ptr.vmem [resolvable:$true] %s34_s8 }
  0x15   :  { %p286_p9 = scmp.lt.u32.totalorder %s282_s11, %s430_s3 }
  0x17   :  { %p288_p10 = pnand %p286_p9, %p283_p8 }
  0x19   :  { %291 = shalt.err (!%p288_p10)
}
  0x1a   :  { %s292_s16 = scalar_lea.vmem %s35_s8, 512  ;;  %p297_p12 = scmp.lt.s32.totalorder %s35_s8, %s35_s8 }
  0x1b   :  { %p293_p11 = scmp.ne.s32.totalorder %s35_s8, %s292_s16  ;;  %p298_p13 = scmp.lt.s32.totalorder %s292_s16, %s292_s16 }
  0x1d   :  { %p299_p0 = por %p298_p13, %p297_p12 }
  0x1f   :  { %p300_p1 = pnand %p299_p0, %p293_p11 }
  0x21   :  { %303 = shalt.err (!%p300_p1)
}
  0x22   :  { %40 = dma.hbm_to_vmem [thread:$0]  %s430_s3, 512, %s35_s8, [#allocation6], %s333_s28, %s333_s28, %s334_s29  }
  0x23   :  { %326 = dma.done.wait [#allocation3], 256  }
  0x24   :  { %327 = vsyncadd [#allocation3], 4294967040 }
  0x25   :  { %328 = dma.done.wait [#allocation6], 512  }
  0x26   :  { %329 = vsyncadd [#allocation6], 4294966784  ;;  %vm51_vm0 = vcmask 261120   ;;  %v100_v0 = vld [vmem:[#allocation5] sm:$0xff]  ;;  %v101_v1 = vld [vmem:[#allocation5 + $0x8] sm:$0xff]  ;;  %v85_v34 = vlaneseq  ;;  %vm200_vm1 = vcmask 523264  }
  0x27   :  { %v102_v2 = vld [vmem:[#allocation5 + $0x10] sm:$0xff]  ;;  %v241_v3 = vpack.c.bf16 %v101_v1, %v100_v0  ;;  %v103_v4 = vld [vmem:[#allocation5 + $0x18] sm:$0xff] }
  0x28   :  { %v49_v5 = vld [vmem:[#allocation2] sm:$0xff]  ;;  %v50_v6 = vld [vmem:[#allocation2 + $0x8] sm:$0xff]  ;;  %v245_v7 = vpack.c.bf16 %v103_v4, %v102_v2  ;;  %v86_v35 = vshrl.u32 %v85_v34, 7 }
  0x29   :  { %v52_v8 = vsel %vm51_vm0, %v49_v5, 0.0  ;;  %v53_v9 = vsel %vm51_vm0, %v50_v6, 0.0  ;;  %v61_v10 = vmul.f32 %v49_v5, %v49_v5  ;;  %242 = vmatprep.subr.bf16.mxu0 %v241_v3  ;;  %v62_v12 = vmul.f32 %v50_v6, %v50_v6  ;;  %v79_v36 = vld [vmem:[%s428_s1] sm:$0x1] }
  0x2a   :  { %v54_v11 = vadd.f32 %v53_v9, %v52_v8  ;;  %244 = vmatpush3.bf16.msra.mxu0 %v241_v3  ;;  %v87_v37 = vsub.s32 0, %v86_v35  ;;  %v81_v40 = vld [vmem:[%s429_s2] sm:$0x1]  ;;  %s336_s2 = smov [#allocation7]  }
  0x2b   :  { %v63_v13 = vsel %vm51_vm0, %v61_v10, 0.0  ;;  %246 = vmatprep.subr.bf16.mxu0 %v245_v7  ;;  %v64_v15 = vsel %vm51_vm0, %v62_v12, 0.0  ;;  %v221_v49 = vld [vmem:[%s431_s4] ss:$0 sm:$0xff]  ;;  %s208_s22 = sshll.u32 %s336_s2, 4  ;;  %s209_s22 = int_to_ptr.vmem [resolvable:$true] %s208_s22 }
  0x2c   :  { %v55_v14 = vrot.slane %v54_v11, 4  ;;  %v65_v16 = vadd.f32 %v64_v15, %v63_v13  ;;  %s304_s4 = scalar_lea.vmem %s209_s22, 256  ;;  %p309_p3 = scmp.lt.s32.totalorder %s209_s22, %s209_s22 }
  0x2d   :  { %p305_p2 = scmp.ne.s32.totalorder %s209_s22, %s304_s4  ;;  %p310_p4 = scmp.lt.s32.totalorder %s304_s4, %s304_s4 }
  0x2e   :  { %v56_v17 = vadd.f32 %v55_v14, %v54_v11  ;;  %248 = vmatpush3.bf16.msra.mxu0 %v245_v7  ;;  %v66_v18 = vrot.slane %v65_v16, 4 }
  0x2f   :  { %p311_p5 = por %p310_p4, %p309_p3 }
  0x30   :  { %v57_v19 = vrot.slane %v56_v17, 2  ;;  %v67_v20 = vadd.f32 %v66_v18, %v65_v16 }
  0x31   :  { %p312_p6 = pnand %p311_p5, %p305_p2 }
  0x32   :  { %v58_v21 = vadd.f32 %v57_v19, %v56_v17  ;;  %v68_v22 = vrot.slane %v67_v20, 2 }
  0x34   :  { %v59_v23 = vrot.slane %v58_v21, 1  ;;  %v69_v24 = vadd.f32 %v68_v22, %v67_v20 }
  0x36   :  { %v60_v25 = vadd.f32 %v59_v23, %v58_v21  ;;  %v70_v26 = vrot.slane %v69_v24, 1 }
  0x38   :  { %v72_v27 = vmul.f32 0.0625, %v60_v25  ;;  %v71_v28 = vadd.f32 %v70_v26, %v69_v24 }
  0x3a   :  { %v74_v29 = vmul.f32 %v72_v27, %v72_v27  ;;  %v73_v30 = vmul.f32 0.0625, %v71_v28 }
  0x3c   :  { %v75_v31 = vsub.f32 %v73_v30, %v74_v29 }
  0x3e   :  { %v76_v32 = vmax.f32 %v75_v31, 0.0 }
  0x40   :  { %v77_v33 = vadd.f32 1e-05, %v76_v32 }
  0x42   :  { %254 = vrsqrt.f32 %v77_v33 }
  0x4c   :  { %v255_v38 = vpop.eup %254 }
  0x4d   :  { %v80_v39 = vmul.f32 %v255_v38, %v79_v36 }
  0x4f   :  { %v82_v41 = vmul.f32 %v80_v39, %v72_v27  ;;  %v88_v42 = vrot.slane %v80_v39, %v87_v37 }
  0x51   :  { %v83_v43 = vsub.f32 %v81_v40, %v82_v41  ;;  %v90_v44 = vmul.f32 %v88_v42, %v49_v5  ;;  %v91_v45 = vmul.f32 %v88_v42, %v50_v6 }
  0x53   :  { %v96_v46 = vrot.slane %v83_v43, %v87_v37 }
  0x55   :  { %v98_v47 = vadd.f32 %v96_v46, %v90_v44  ;;  %v99_v48 = vadd.f32 %v96_v46, %v91_v45 }
  0x57   :  { %238 = vmatprep.mubr.msk.f32.mxu0 %vm51_vm0, %v98_v47 }
  0x58   :  { %239 = vmatmul.mubr.msk.f32.vlgmr.msra.gmra.mrb[0].mxu0 %vm51_vm0, %v99_v48 }
 0x12b   :  { %v240_v50 = vpop.f32.mrb[0].mxu0 }
 0x12c   :  { %v189_v51 = vadd.f32 %v240_v50, %v221_v49  ;;  %v183_v52 = vpop.f32.mrb[1].mxu0 }
 0x12d   :  { %v184_v53 = vadd.f32 %v221_v49, %v183_v52 }
 0x12e   :  { %v193_v54 = vmul.f32 0.5, %v189_v51 }
 0x12f   :  { %v192_v55 = vmul.f32 0.5, %v184_v53 }
 0x130   :  { %256 = vtanh.f32 %v193_v54 }
 0x131   :  { %258 = vtanh.f32 %v192_v55 }
 0x13a   :  { %v257_v56 = vpop.eup %256 }
 0x13b   :  { %v259_v57 = vpop.eup %258  ;;  %v197_v58 = vmul.f32 0.5, %v257_v56 }
 0x13c   :  { %v196_v59 = vmul.f32 0.5, %v259_v57 }
 0x13d   :  { %v199_v60 = vadd.f32 0.5, %v197_v58 }
 0x13e   :  { %v198_v61 = vadd.f32 0.5, %v196_v59 }
 0x13f   :  { %202 = vst.msk [vmem:[#allocation7 + $0x8] sm:$0xff] %vm200_vm1, %v199_v60 }
 0x140   :  { %201 = vst.msk [vmem:[#allocation7] sm:$0xff] %vm200_vm1, %v198_v61 }
 0x141   :  { %315 = shalt.err (!%p312_p6)
}
 0x142   :  { %s316_s25 = scalar_lea.hbm %s432_s5, 256 }
 0x143   :  { %p317_p7 = scmp.ne.s32.totalorder %s432_s5, %s316_s25  ;;  %p320_p8 = scmp.lt.u32.totalorder %s316_s25, %s432_s5 }
 0x145   :  { %p322_p9 = pnand %p320_p8, %p317_p7 }
 0x147   :  { %325 = shalt.err (!%p322_p9)
}
 0x148   :  { %214 = dma.vmem_to_hbm [thread:$0]  %s209_s22, 256, %s432_s5, [#allocation4], %s333_s28, %s333_s28, %s334_s29  }
 0x149   :  { %330 = dma.done.wait [#allocation4], 256  }
 0x14a   :  { %331 = vsyncadd [#allocation4], 4294967040 }
 0x14b   :  { %218 = vsyncpa [#allocation3], 1 }
 0x14c   :  { %219 = vsyncpa [#allocation6], 1 }
 0x14d   :  { %220 = vsyncpa [#allocation4], 1 }

</bundles_post_ra>
